<compile_context>
chip_gen: v6e
topology: v6e:2x2x1
jax: 0.10.0
libtpu: 0.0.40
codegen_flags: <defaults>
</compile_context>

<pallas_src>
import functools

import jax
import jax.numpy as jnp
from jax.experimental import pallas as pl
from jax.experimental.pallas import tpu as pltpu

LN_EPS = 1e-5


def _task_embedding_kernel(x_ref, w_ref, p_ref, o_ref):
    # x_ref: [tb, emb], w_ref: [emb, emb], p_ref: [3, emb] = (bias, gamma, beta)
    emb = x_ref.shape[-1]
    params = p_ref[...]                      # single load of the merged params
    bias = params[0:1, :]
    gamma = params[1:2, :]
    beta = params[2:3, :]

    # Linear (MXU) + ReLU, accumulate in f32.
    h = jnp.dot(x_ref[...], w_ref[...], preferred_element_type=jnp.float32)
    h = jnp.maximum(h + bias, 0.0)

    # One-pass LayerNorm statistics: both reductions issued back-to-back,
    # biased variance via E[h^2] - mean^2 (matches PyTorch LayerNorm).
    s1 = jnp.sum(h, axis=-1, keepdims=True)
    s2 = jnp.sum(h * h, axis=-1, keepdims=True)
    inv_n = 1.0 / float(emb)
    mean = s1 * inv_n
    var = s2 * inv_n - mean * mean
    inv_std = jax.lax.rsqrt(var + LN_EPS)

    o_ref[...] = ((h - mean) * inv_std * gamma + beta).astype(o_ref.dtype)


@functools.partial(jax.jit, static_argnames=())
def task_embedding_forward(x, w, b, gamma, beta):
    batch, emb = x.shape

    # Merge the three tiny per-feature parameter vectors into one array
    # (one DMA, one double-buffer allocation).
    params = jnp.stack([b, gamma, beta], axis=0)  # [3, emb]

    # Batch-tiled grid: single full-array block for small batches, 512-row
    # tiles (multiple of 8 sublanes) for large ones.
    if batch % 128 == 0:
        tb = min(batch, 512)
    else:
        tb = batch
    grid = (pl.cdiv(batch, tb),)

    return pl.pallas_call(
        _task_embedding_kernel,
        out_shape=jax.ShapeDtypeStruct((batch, emb), x.dtype),
        grid_spec=pltpu.PrefetchScalarGridSpec(
            num_scalar_prefetch=0,
            grid=grid,
            in_specs=[
                pl.BlockSpec((tb, emb), lambda i: (i, 0)),     # x (batch-tiled)
                pl.BlockSpec((emb, emb), lambda i: (0, 0)),    # weight (resident)
                pl.BlockSpec((3, emb), lambda i: (0, 0)),      # merged b/gamma/beta
            ],
            out_specs=pl.BlockSpec((tb, emb), lambda i: (i, 0)),
        ),
        compiler_params=pltpu.CompilerParams(
            # batch tiles are independent -> let v7x shard them across its 2 TCs
            dimension_semantics=("parallel",),
        ),
    )(x, w, params)


def reference_forward(x, w, b, gamma, beta):
    h = x @ w + b
    h = jnp.maximum(h, 0.0)
    mean = jnp.mean(h, axis=-1, keepdims=True)
    var = jnp.mean((h - mean) ** 2, axis=-1, keepdims=True)
    return (h - mean) / jnp.sqrt(var + LN_EPS) * gamma + beta


if __name__ == "__main__":
    embedding_dim = 32
    batch = 8

    key = jax.random.PRNGKey(0)
    kx, kw, kb = jax.random.split(key, 3)

    # Deterministic synthetic parameters mirroring nn.Linear(32, 32) + nn.LayerNorm(32).
    x = jax.random.normal(kx, (batch, embedding_dim), dtype=jnp.float32)
    bound = 1.0 / jnp.sqrt(embedding_dim)
    # Stored as [emb_in, emb_out]: kernel computes x @ W (== x @ W_torch.T).
    w = jax.random.uniform(
        kw, (embedding_dim, embedding_dim), minval=-bound, maxval=bound,
        dtype=jnp.float32)
    b = jax.random.uniform(
        kb, (embedding_dim,), minval=-bound, maxval=bound, dtype=jnp.float32)
    gamma = jnp.ones((embedding_dim,), dtype=jnp.float32)
    beta = jnp.zeros((embedding_dim,), dtype=jnp.float32)

    out = task_embedding_forward(x, w, b, gamma, beta)
    jax.block_until_ready(out)

    ref = reference_forward(x, w, b, gamma, beta)
    assert out.shape == (batch, embedding_dim)
    assert jnp.allclose(out, ref, atol=1e-5, rtol=1e-5)

    print("KERNEL_OK")
</pallas_src>

<mosaic_0001>
module attributes {stable_mosaic.version = 11 : i64} {
  func.func @_task_embedding_kernel(%arg0: i32, %arg1: memref<8x32xf32, #tpu.memory_space<vmem>>, %arg2: memref<32x32xf32, #tpu.memory_space<vmem>>, %arg3: memref<3x32xf32, #tpu.memory_space<vmem>>, %arg4: memref<8x32xf32, #tpu.memory_space<vmem>>) attributes {dimension_semantics = [#tpu.dimension_semantics<parallel>], iteration_bounds = array<i64: 1>, scalar_prefetch = 0 : i64, scratch_operands = 0 : i64, tpu.core_type = #tpu.core_type<tc>, window_params = [{transform_indices = @transform_0, window_bounds = array<i64: 8, 32>}, {pipeline_mode = #tpu.pipeline_mode<synchronous>, transform_indices = @transform_1, window_bounds = array<i64: 32, 32>}, {pipeline_mode = #tpu.pipeline_mode<synchronous>, transform_indices = @transform_2, window_bounds = array<i64: 3, 32>}, {transform_indices = @transform_3, window_bounds = array<i64: 8, 32>}]} {
    %c0 = arith.constant 0 : index
    %c0_0 = arith.constant 0 : index
    %0 = vector.load %arg3[%c0, %c0_0] : memref<3x32xf32, #tpu.memory_space<vmem>>, vector<3x32xf32>
    %1 = vector.extract_strided_slice %0 {offsets = [0, 0], sizes = [1, 32], strides = [1, 1]} : vector<3x32xf32> to vector<1x32xf32>
    %2 = vector.extract_strided_slice %0 {offsets = [1, 0], sizes = [1, 32], strides = [1, 1]} : vector<3x32xf32> to vector<1x32xf32>
    %3 = vector.extract_strided_slice %0 {offsets = [2, 0], sizes = [1, 32], strides = [1, 1]} : vector<3x32xf32> to vector<1x32xf32>
    %c0_1 = arith.constant 0 : index
    %c0_2 = arith.constant 0 : index
    %4 = vector.load %arg1[%c0_1, %c0_2] : memref<8x32xf32, #tpu.memory_space<vmem>>, vector<8x32xf32>
    %c0_3 = arith.constant 0 : index
    %c0_4 = arith.constant 0 : index
    %5 = vector.load %arg2[%c0_3, %c0_4] : memref<32x32xf32, #tpu.memory_space<vmem>>, vector<32x32xf32>
    %cst = arith.constant dense<0.000000e+00> : vector<8x32xf32>
    %6 = tpu.matmul %4, %5, %cst {dimension_numbers = #tpu.dot_dimension_numbers<[1], [0], [0], [1], [0, 0, 1, 1], [], []>} : vector<8x32xf32>, vector<32x32xf32>, vector<8x32xf32> -> vector<8x32xf32>
    %7 = vector.broadcast %1 : vector<1x32xf32> to vector<8x32xf32>
    %8 = arith.addf %6, %7 : vector<8x32xf32>
    %cst_5 = arith.constant 0.000000e+00 : f32
    %9 = vector.broadcast %cst_5 : f32 to vector<8x32xf32>
    %10 = arith.maximumf %8, %9 : vector<8x32xf32>
    %cst_6 = arith.constant dense<0.000000e+00> : vector<8xf32>
    %11 = vector.multi_reduction <add>, %10, %cst_6 [1] : vector<8x32xf32> to vector<8xf32>
    %12 = vector.shape_cast %11 : vector<8xf32> to vector<8x1xf32>
    %13 = arith.mulf %10, %10 : vector<8x32xf32>
    %cst_7 = arith.constant dense<0.000000e+00> : vector<8xf32>
    %14 = vector.multi_reduction <add>, %13, %cst_7 [1] : vector<8x32xf32> to vector<8xf32>
    %15 = vector.shape_cast %14 : vector<8xf32> to vector<8x1xf32>
    %cst_8 = arith.constant 3.125000e-02 : f32
    %16 = vector.broadcast %cst_8 : f32 to vector<8x1xf32>
    %17 = arith.mulf %12, %16 : vector<8x1xf32>
    %cst_9 = arith.constant 3.125000e-02 : f32
    %18 = vector.broadcast %cst_9 : f32 to vector<8x1xf32>
    %19 = arith.mulf %15, %18 : vector<8x1xf32>
    %20 = arith.mulf %17, %17 : vector<8x1xf32>
    %21 = arith.subf %19, %20 : vector<8x1xf32>
    %cst_10 = arith.constant 9.99999974E-6 : f32
    %22 = vector.broadcast %cst_10 : f32 to vector<8x1xf32>
    %23 = arith.addf %21, %22 : vector<8x1xf32>
    %24 = math.rsqrt %23 : vector<8x1xf32>
    %25 = vector.broadcast %17 : vector<8x1xf32> to vector<8x32xf32>
    %26 = arith.subf %10, %25 : vector<8x32xf32>
    %27 = vector.broadcast %24 : vector<8x1xf32> to vector<8x32xf32>
    %28 = arith.mulf %26, %27 : vector<8x32xf32>
    %29 = vector.broadcast %2 : vector<1x32xf32> to vector<8x32xf32>
    %30 = arith.mulf %28, %29 : vector<8x32xf32>
    %31 = vector.broadcast %3 : vector<1x32xf32> to vector<8x32xf32>
    %32 = arith.addf %30, %31 : vector<8x32xf32>
    %c0_11 = arith.constant 0 : index
    %c0_12 = arith.constant 0 : index
    %33 = vector.load %arg4[%c0_11, %c0_12] : memref<8x32xf32, #tpu.memory_space<vmem>>, vector<8x32xf32>
    tpu.vector_store %arg4[%c0_11, %c0_12], %32 {strides = array<i32>} : memref<8x32xf32, #tpu.memory_space<vmem>>, vector<8x32xf32>,
    return
  }
  func.func @transform_0(%arg0: i32) -> (i32, i32) {
    %c0_i32 = arith.constant 0 : i32
    %c0_i32_0 = arith.constant 0 : i32
    return %arg0, %c0_i32 : i32, i32
  }
  func.func @transform_1(%arg0: i32) -> (i32, i32) {
    %c0_i32 = arith.constant 0 : i32
    %c0_i32_0 = arith.constant 0 : i32
    %c0_i32_1 = arith.constant 0 : i32
    return %c0_i32, %c0_i32_0 : i32, i32
  }
  func.func @transform_2(%arg0: i32) -> (i32, i32) {
    %c0_i32 = arith.constant 0 : i32
    %c0_i32_0 = arith.constant 0 : i32
    %c0_i32_1 = arith.constant 0 : i32
    return %c0_i32, %c0_i32_0 : i32, i32
  }
  func.func @transform_3(%arg0: i32) -> (i32, i32) {
    %c0_i32 = arith.constant 0 : i32
    %c0_i32_0 = arith.constant 0 : i32
    return %arg0, %c0_i32 : i32, i32
  }
}

</mosaic_0001>

<bundles_post_ra>
// kernel: task_embedding_forward.1
= control target key start
LH: loop header
LB: loop body
LE: loop exit
PB: predicated region body
PF: predicated region fallthrough
CT: control target
= control target key end

     0   :  { %8 = vsyncpa [#allocation3], 0  ;;  %s266_s0 = inlined_call_operand.vmem [shape: f32[8,32], index: 0, kind: input, shape index: {}]   ;;  %s267_s1 = inlined_call_operand.hbm [shape: f32[32,32], index: 1, kind: input, shape index: {}]   ;;  %s268_s2 = inlined_call_operand.vmem [shape: f32[3,32], index: 2, kind: input, shape index: {}]   ;;  %s269_s3 = inlined_call_operand.hbm [shape: f32[8,32], index: 3, kind: output, shape index: {}]  }
   0x1   :  { %9 = vsyncpa [#allocation4], 0  ;;  %s224_s12 = smov [#allocation2]  }
   0x2   :  { %s17_s13 = sshll.u32 %s224_s12, 4  ;;  %s18_s13 = int_to_ptr.vmem [resolvable:$true] %s17_s13 }
   0x3   :  { %s188_s14 = scalar_lea.vmem %s18_s13, 512  ;;  %p193_p1 = scmp.lt.s32.totalorder %s18_s13, %s18_s13 }
   0x4   :  { %p189_p0 = scmp.ne.s32.totalorder %s18_s13, %s188_s14  ;;  %p194_p2 = scmp.lt.s32.totalorder %s188_s14, %s188_s14 }
   0x6   :  { %p195_p3 = por %p194_p2, %p193_p1 }
   0x8   :  { %p196_p4 = pnand %p195_p3, %p189_p0 }
   0xa   :  { %199 = shalt.err (!%p196_p4)
}
   0xb   :  { %s225_s15 = smov 128   ;;  %s226_s16 = smov 8  }
   0xc   :  { %23 = dma.hbm_to_vmem [thread:$0]  %s267_s1, 512, %s18_s13, [#allocation3], %s225_s15, %s225_s15, %s226_s16  }
   0xd   :  { %220 = dma.done.wait [#allocation3], 512  }
   0xe   :  { %221 = vsyncadd [#allocation3], 4294966784  ;;  %v227_v0 = vmov 0.0   ;;  %vm228_vm0 = vmmov 0   ;;  %v34_v1 = vld [vmem:[#allocation2 + $0x18] sm:$0xff]  ;;  %v33_v2 = vld [vmem:[#allocation2 + $0x10] sm:$0xff]  ;;  %v35_v6 = vlaneseq }
   0xf   :  { %161 = vmatprep.subr.mxu0 %v227_v0  ;;  %169 = vmatprep.mubr.msk.f32.mxu0 %vm228_vm0, %v227_v0  ;;  %v32_v3 = vld [vmem:[#allocation2 + $0x8] sm:$0xff]  ;;  %v31_v4 = vld [vmem:[#allocation2] sm:$0xff]  ;;  %vm39_vm1 = vcmask 261120  }
  0x10   :  { %162 = vmatpush3.msra.mxu0 %v34_v1  ;;  %v30_v5 = vld [vmem:[%s266_s0] sm:$0xff]  ;;  %v36_v7 = vshrl.u32 %v35_v6, 7  ;;  %s229_s0 = smov [#allocation5]  }
  0x11   :  { %163 = vmatprep.subr.mxu0 %v227_v0  ;;  %v29_v9 = vld [vmem:[%s268_s2] sm:$0x7]  ;;  %s146_s2 = sshll.u32 %s229_s0, 4  ;;  %s147_s2 = int_to_ptr.vmem [resolvable:$true] %s146_s2 }
  0x12   :  { %164 = vmatpush3.msra.mxu0 %v33_v2  ;;  %v37_v8 = vsub.s32 0, %v36_v7  ;;  %v131_v25 = vsub.s32 1, %v36_v7  ;;  %v136_v26 = vsub.s32 2, %v36_v7  ;;  %s200_s22 = scalar_lea.vmem %s147_s2, 128  ;;  %p205_p6 = scmp.lt.s32.totalorder %s147_s2, %s147_s2 }
  0x13   :  { %165 = vmatprep.subr.mxu0 %v227_v0  ;;  %p201_p5 = scmp.ne.s32.totalorder %s147_s2, %s200_s22  ;;  %p206_p7 = scmp.lt.s32.totalorder %s200_s22, %s200_s22 }
  0x14   :  { %166 = vmatpush3.msra.mxu0 %v32_v3  ;;  %v38_v10 = vrot.slane %v29_v9, %v37_v8  ;;  %v132_v27 = vrot.slane %v29_v9, %v131_v25  ;;  %v137_v30 = vrot.slane %v29_v9, %v136_v26 }
  0x15   :  { %167 = vmatprep.subr.mxu0 %v227_v0  ;;  %p207_p8 = por %p206_p7, %p205_p6 }
  0x16   :  { %168 = vmatpush3.msra.mxu0 %v31_v4 }
  0x17   :  { %170 = vmatmul.mubr.msk.f32.vlgmr.msra.gmra.mxu0 %vm39_vm1, %v30_v5  ;;  %p208_p9 = pnand %p207_p8, %p201_p5 }
  0xd7   :  { %v109_v11 = vpop.f32.mrf.mxu0 }
  0xd8   :  { %v110_v12 = vadd.f32 %v109_v11, %v38_v10 }
  0xd9   :  { %v171_v13 = vpop.f32.mrf.mxu0 }
  0xda   :  { %v113_v14 = vmax.f32 %v110_v12, 0.0 }
  0xdc   :  { %v114_v15 = vsel %vm39_vm1, %v113_v14, 0.0  ;;  %v117_v16 = vmul.f32 %v113_v14, %v113_v14 }
  0xdd   :  { %115 = vadd.xlane.f32.xlu0 %v114_v15 }
  0xde   :  { %v118_v17 = vsel %vm39_vm1, %v117_v16, 0.0 }
  0xe1   :  { %119 = vadd.xlane.f32.xlu0 %v118_v17 }
 0x166   :  { %v116_v18 = vpop.xlane.xlu0 %115 }
 0x167   :  { %v121_v19 = vmul.f32 0.03125, %v116_v18 }
 0x169   :  { %v123_v21 = vmul.f32 %v121_v19, %v121_v19  ;;  %v127_v28 = vsub.f32 %v113_v14, %v121_v19 }
 0x16a   :  { %v120_v20 = vpop.xlane.xlu0 %119 }
 0x16b   :  { %v122_v22 = vmul.f32 0.03125, %v120_v20 }
 0x16d   :  { %v124_v23 = vsub.f32 %v122_v22, %v123_v21 }
 0x16f   :  { %v125_v24 = vadd.f32 1e-05, %v124_v23 }
 0x171   :  { %178 = vrsqrt.f32 %v125_v24 }
 0x17e   :  { %v179_v29 = vpop.eup %178 }
 0x17f   :  { %v128_v31 = vmul.f32 %v179_v29, %v127_v28 }
 0x181   :  { %v133_v32 = vmul.f32 %v132_v27, %v128_v31 }
 0x183   :  { %v138_v33 = vadd.f32 %v137_v30, %v133_v32 }
 0x185   :  { %139 = vst.msk [vmem:[#allocation5] sm:$0xff] %vm39_vm1, %v138_v33 }
 0x186   :  { %211 = shalt.err (!%p208_p9)
}
 0x187   :  { %149 = dma.vmem_to_hbm [thread:$0]  %s147_s2, 128, %s269_s3, [#allocation4]  }
 0x188   :  { %222 = dma.done.wait [#allocation4], 128  }
 0x189   :  { %223 = vsyncadd [#allocation4], 4294967168 }
 0x18a   :  { %153 = vsyncpa [#allocation3], 1 }
 0x18b   :  { %154 = vsyncpa [#allocation4], 1 }

</bundles_post_ra>
